<compile_context>
chip_gen: v6e
topology: v6e:2x2x1
jax: 0.10.0
libtpu: 0.0.40
codegen_flags: <defaults>
</compile_context>

<pallas_src>
import jax
import jax.numpy as jnp
from jax.experimental import pallas as pl
from jax.experimental.pallas import tpu as pltpu


# ------------------------------ tiling helpers ------------------------------ #
def _sublane_mult(dtype):
    """Native sublane tile multiple for a dtype (f32: 8, bf16: 16, int8: 32)."""
    return {4: 8, 2: 16, 1: 32}.get(jnp.dtype(dtype).itemsize, 8)


def _pick_tile(dim, target, mult):
    """Largest tile <= target that divides dim and is a multiple of `mult`,
    otherwise the full dim (full extent is always a legal block)."""
    if dim <= target:
        return dim
    t = (target // mult) * mult
    while t >= mult:
        if dim % t == 0:
            return t
        t -= mult
    return dim


def _pick_head_tile(n_head, head_dim, *, target_lanes=512, max_heads=8):
    """Heads packed per flash block.  th must divide n_head and yield a
    lane-aligned output slab (th*head_dim % 128 == 0) unless it spans all heads
    (the full extent is always legal).  Prefer th*head_dim ~= target_lanes."""
    legal = [t for t in range(1, n_head + 1)
             if n_head % t == 0 and (t * head_dim) % 128 == 0 and t <= max_heads]
    for t in legal:
        if t * head_dim >= target_lanes:
            return t
    if legal:
        return legal[-1]
    return n_head  # e.g. tiny test configs where head_dim < 128


# ---------------------- tiled linear (X @ W + b) kernel ---------------------- #
def _linear_kernel(x_ref, w_ref, b_ref, o_ref, acc_ref):
    @pl.when(pl.program_id(2) == 0)
    def _():
        acc_ref[...] = jnp.zeros_like(acc_ref)

    # bf16 operands, f32 accumulation on the MXU.
    acc_ref[...] += jnp.dot(x_ref[...], w_ref[...],
                            preferred_element_type=jnp.float32)

    @pl.when(pl.program_id(2) == pl.num_programs(2) - 1)
    def _():
        o_ref[...] = (acc_ref[...] + b_ref[...].astype(jnp.float32)
                      ).astype(o_ref.dtype)


def pallas_linear(x2d, w, b, *, out_dtype=None, tm=512, tn=512, tk=512):
    """x2d: [M, K] (bf16); w: [K, N] (bf16, already transposed vs. torch);
    b: [1, N] f32 (added post-accumulation). Returns [M, N] in out_dtype."""
    M, K = x2d.shape
    N = w.shape[1]
    out_dtype = out_dtype if out_dtype is not None else x2d.dtype
    tm = _pick_tile(M, tm, _sublane_mult(x2d.dtype))
    tn = _pick_tile(N, tn, 128)
    # Prefer K tiles that are multiples of 256 (fills the 256-deep v6e/v7x MXU).
    tk = _pick_tile(K, tk, 256 if K % 256 == 0 else 128)
    cost = pl.CostEstimate(
        flops=int(2 * M * N * K), transcendentals=0,
        bytes_accessed=int(x2d.dtype.itemsize * (M * K + K * N)
                           + 4 * N + jnp.dtype(out_dtype).itemsize * M * N))
    return pl.pallas_call(
        _linear_kernel,
        out_shape=jax.ShapeDtypeStruct((M, N), out_dtype),
        grid=(M // tm, N // tn, K // tk),
        in_specs=[
            pl.BlockSpec((tm, tk), lambda i, j, k: (i, k)),
            pl.BlockSpec((tk, tn), lambda i, j, k: (k, j)),
            pl.BlockSpec((1, tn), lambda i, j, k: (0, j)),
        ],
        out_specs=pl.BlockSpec((tm, tn), lambda i, j, k: (i, j)),
        scratch_shapes=[pltpu.VMEM((tm, tn), jnp.float32)],
        compiler_params=pltpu.CompilerParams(
            dimension_semantics=("parallel", "parallel", "arbitrary"),
            vmem_limit_bytes=32 * 1024 * 1024),
        cost_estimate=cost,
    )(x2d, w, b)


# ----------------------- flash attention (KV-tiled) kernel -------------------- #
def _flash_attn_kernel(q_ref, k_ref, v_ref, alibi_ref, mask_ref, o_ref,
                       m_sc, l_sc, acc_sc):
    kv = pl.program_id(3)
    th, _, hd = q_ref.shape

    @pl.when(kv == 0)
    def _():
        m_sc[...] = jnp.full_like(m_sc, -jnp.inf)
        l_sc[...] = jnp.zeros_like(l_sc)
        acc_sc[...] = jnp.zeros_like(acc_sc)

    # Scores (th, tq, tkv) on the MXU: bf16 operands, f32 accumulation.
    s = jnp.einsum("hqd,hkd->hqk", q_ref[...], k_ref[...],
                   preferred_element_type=jnp.float32)
    # 1/sqrt(head_dim) is pre-folded into the Q projection weights, so only
    # the additive alibi + mask remain on the VPU.
    s = s + alibi_ref[...].astype(jnp.float32) + mask_ref[...].astype(jnp.float32)

    m_prev = m_sc[...]
    m_new = jnp.maximum(m_prev, jnp.max(s, axis=-1, keepdims=True))
    alpha = jnp.exp(m_prev - m_new)
    p = jnp.exp(s - m_new)
    l_sc[...] = alpha * l_sc[...] + jnp.sum(p, axis=-1, keepdims=True)
    acc_sc[...] = alpha * acc_sc[...] + jnp.einsum(
        "hqk,hkd->hqd", p.astype(v_ref.dtype), v_ref[...],
        preferred_element_type=jnp.float32)
    m_sc[...] = m_new

    @pl.when(kv == pl.num_programs(3) - 1)
    def _():
        inv_l = pl.reciprocal(l_sc[...], approx=True)   # EUP, off the VPU path
        ctx = acc_sc[...] * inv_l                       # (th, tq, hd) f32
        # Fold heads into the lane dimension -> lane-dense [tq, th*hd] output
        # block (dense vst for hd multiples of 128) that feeds the output
        # projection with no HBM transpose in between.
        for h in range(th):                             # static unroll, once per block
            o_ref[:, h * hd:(h + 1) * hd] = ctx[h].astype(o_ref.dtype)


def pallas_flash_attention(q, k, v, alibi, mask, *, tq=512, tkv=512):
    """q/k/v: [B, nh, S, hd] (bf16); alibi: [B, nh, 1, Skv]; mask: [B, 1, Sq, Skv]
    (both additive, bf16).  Returns context lane-dense as [B, Sq, nh*hd]."""
    B, nh, Sq, hd = q.shape
    Skv = k.shape[2]
    th = _pick_head_tile(nh, hd)              # heads packed per block
    tq = _pick_tile(Sq, tq, _sublane_mult(q.dtype))
    tkv = _pick_tile(Skv, tkv, 128)
    cost = pl.CostEstimate(
        flops=int(4 * B * nh * Sq * Skv * hd),
        transcendentals=int(B * nh * Sq * Skv),
        bytes_accessed=int(q.dtype.itemsize *
                           (2 * B * nh * Sq * hd
                            + 2 * B * nh * Skv * hd * (Sq // tq)
                            + B * Sq * Skv * (nh // th) + B * nh * Skv)))
    return pl.pallas_call(
        _flash_attn_kernel,
        out_shape=jax.ShapeDtypeStruct((B, Sq, nh * hd), q.dtype),
        grid=(B, nh // th, Sq // tq, Skv // tkv),
        in_specs=[
            pl.BlockSpec((None, th, tq, hd), lambda b, h, i, j: (b, h, i, 0)),
            pl.BlockSpec((None, th, tkv, hd), lambda b, h, i, j: (b, h, j, 0)),
            pl.BlockSpec((None, th, tkv, hd), lambda b, h, i, j: (b, h, j, 0)),
            pl.BlockSpec((None, th, 1, tkv), lambda b, h, i, j: (b, h, 0, j)),
            pl.BlockSpec((None, None, tq, tkv), lambda b, h, i, j: (b, 0, i, j)),
        ],
        # Output resident across the kv axis; heads folded into the lane dim.
        out_specs=pl.BlockSpec((None, tq, th * hd), lambda b, h, i, j: (b, i, h)),
        scratch_shapes=[
            pltpu.VMEM((th, tq, 1), jnp.float32),    # running max m
            pltpu.VMEM((th, tq, 1), jnp.float32),    # running denom l
            pltpu.VMEM((th, tq, hd), jnp.float32),   # running context acc
        ],
        compiler_params=pltpu.CompilerParams(
            dimension_semantics=("parallel", "parallel", "parallel", "arbitrary"),
            vmem_limit_bytes=32 * 1024 * 1024),      # raises v5e's 16 MiB default
        cost_estimate=cost,
    )(q, k, v, alibi, mask)


# ------------------------------- module wrapper ------------------------------ #
class FastBloomAttentionPallas:
    def __init__(self, hidden_size, n_head, layer_number, key):
        assert hidden_size % n_head == 0
        self.hidden_size = hidden_size
        self.n_head = n_head
        self.head_dim = hidden_size // n_head
        self.layer_number = max(1, layer_number)
        self.norm_factor = self.layer_number * (self.head_dim ** 0.5)
        inv_scale = 1.0 / (self.head_dim ** 0.5)

        k1, k2, k3, k4 = jax.random.split(key, 4)
        bound = 1.0 / (hidden_size ** 0.5)
        # Canonical weights stored in bf16 ([in, out] layout, transposed vs.
        # torch nn.Linear.weight); biases kept f32 (added post-accumulation).
        self.qkv_w = jax.random.uniform(k1, (hidden_size, 3 * hidden_size),
                                        jnp.float32, -bound, bound).astype(jnp.bfloat16)
        self.qkv_b = jax.random.uniform(k2, (1, 3 * hidden_size),
                                        jnp.float32, -bound, bound)
        self.dense_w = jax.random.uniform(k3, (hidden_size, hidden_size),
                                          jnp.float32, -bound, bound).astype(jnp.bfloat16)
        self.dense_b = jax.random.uniform(k4, (1, hidden_size),
                                          jnp.float32, -bound, bound)
        # Fold 1/sqrt(head_dim) into the interleaved Q columns of the QKV
        # projection:  (qk/(L*sqrt(hd)) + alibi/L)*L + mask
        #           == (q/sqrt(hd)).k + alibi + mask,
        # so the flash kernel does no per-score scaling at all.
        col_scale = jnp.ones((n_head, 3, self.head_dim), jnp.float32)
        col_scale = col_scale.at[:, 0, :].set(inv_scale).reshape(1, 3 * hidden_size)
        self.qkv_w_fused = (self.qkv_w.astype(jnp.float32) * col_scale
                            ).astype(jnp.bfloat16)
        self.qkv_b_fused = self.qkv_b * col_scale

    def __call__(self, hidden_states, attention_mask, alibi,
                 past_key=None, past_value=None):
        B, S, H = hidden_states.shape
        nh, hd = self.n_head, self.head_dim
        in_dtype = hidden_states.dtype

        # QKV projection (bf16 operands, f32 output so the returned K/V cache
        # keeps the input dtype).  The Q columns are pre-scaled by 1/sqrt(hd).
        x_bf = hidden_states.reshape(B * S, H).astype(jnp.bfloat16)
        qkv = pallas_linear(x_bf, self.qkv_w_fused, self.qkv_b_fused,
                            out_dtype=in_dtype)
        qkv = qkv.reshape(B, S, nh, 3, hd)          # contiguous view, no copy

        # K/V materialized in the returned cache layout [B, nh, S, hd].
        k = jnp.transpose(qkv[:, :, :, 1, :], (0, 2, 1, 3))
        v = jnp.transpose(qkv[:, :, :, 2, :], (0, 2, 1, 3))
        if past_key is not None:
            k = jnp.concatenate([past_key, k], axis=2)
        if past_value is not None:
            v = jnp.concatenate([past_value, v], axis=2)

        # bf16 attention operands at the kernel boundary (halves attention
        # HBM/VMEM streaming; f32 accumulation in-kernel).  Only the Q/K/V
        # thirds are touched — the old full-QKV HBM transpose is gone.
        # TODO(synk): Q could be fed straight from the [B,S,nh,3,hd] view via a
        # squeezed BlockSpec to skip this copy entirely.
        q_bf = jnp.transpose(qkv[:, :, :, 0, :], (0, 2, 1, 3)).astype(jnp.bfloat16)
        k_bf = k.astype(jnp.bfloat16)
        v_bf = v.astype(jnp.bfloat16)
        mask_bf = attention_mask.astype(jnp.bfloat16)
        alibi_bf = alibi.astype(jnp.bfloat16)
        # TODO(synk): for the pure-causal case the mask could be generated
        # in-kernel from iota + a scalar-prefetched length instead of streamed.

        # Flash attention emits lane-dense [B, S, H] (heads folded into lanes).
        ctx = pallas_flash_attention(q_bf, k_bf, v_bf, alibi_bf, mask_bf)

        # Output projection: plain big-K tiled linear, no HBM transpose needed.
        out = pallas_linear(ctx.reshape(B * S, H), self.dense_w, self.dense_b,
                            out_dtype=in_dtype)
        return out.reshape(B, S, H), (k, v)


# ------------------------------ pure-JAX reference ---------------------------- #
def reference_forward(mod, hidden_states, attention_mask, alibi,
                      past_key=None, past_value=None):
    B, S, H = hidden_states.shape
    nh, hd = mod.n_head, mod.head_dim
    qkv_w = mod.qkv_w.astype(jnp.float32)
    dense_w = mod.dense_w.astype(jnp.float32)
    qkv = hidden_states.reshape(B * S, H) @ qkv_w + mod.qkv_b
    qkv = qkv.reshape(B, S, nh, 3 * hd).transpose(0, 2, 1, 3)
    q, k, v = qkv[..., :hd], qkv[..., hd:2 * hd], qkv[..., 2 * hd:]
    if past_key is not None:
        k = jnp.concatenate([past_key, k], axis=2)
    if past_value is not None:
        v = jnp.concatenate([past_value, v], axis=2)
    scores = jnp.einsum("bhqd,bhkd->bhqk", q, k) / mod.norm_factor
    scores = scores + alibi / mod.layer_number
    scores = scores * mod.layer_number + attention_mask
    probs = jax.nn.softmax(scores.astype(jnp.float32), axis=-1)
    ctx = jnp.einsum("bhqk,bhkd->bhqd", probs.astype(v.dtype), v)
    ctx = ctx.transpose(0, 2, 1, 3).reshape(B, S, H)
    out = ctx.reshape(B * S, H) @ dense_w + mod.dense_b
    return out.reshape(B, S, H), (k, v)


if __name__ == "__main__":
    B, S, H, NH = 2, 8, 32, 4
    LAYER_NUMBER = 2

    root = jax.random.PRNGKey(0)
    k_param, k_x, k_alibi = jax.random.split(root, 3)

    module = FastBloomAttentionPallas(H, NH, LAYER_NUMBER, k_param)

    hidden_states = jax.random.normal(k_x, (B, S, H), jnp.float32)
    # additive causal mask: 0 allowed, -1e9 masked; shape [B, 1, S, S]
    causal = jnp.tril(jnp.ones((S, S), jnp.float32))
    attention_mask = jnp.where(causal == 1.0, 0.0, -1e9)[None, None]
    attention_mask = jnp.broadcast_to(attention_mask, (B, 1, S, S))
    # alibi bias: [B, n_head, 1, S]
    alibi = 0.1 * jax.random.normal(k_alibi, (B, NH, 1, S), jnp.float32)

    out, (key_out, value_out) = module(hidden_states, attention_mask, alibi)
    jax.block_until_ready(out)
    jax.block_until_ready(key_out)
    jax.block_until_ready(value_out)

    ref_out, (ref_k, ref_v) = reference_forward(module, hidden_states,
                                                attention_mask, alibi)
    assert out.shape == (B, S, H)
    assert key_out.shape == (B, NH, S, H // NH)
    assert value_out.shape == (B, NH, S, H // NH)
    # Tolerances account for bf16 operand casts (activations, probs, context),
    # the pre-scaled Q weights and the approximate EUP reciprocal in the
    # softmax normalization.
    assert jnp.allclose(out, ref_out, atol=3e-2, rtol=3e-2), \
        float(jnp.max(jnp.abs(out - ref_out)))
    assert jnp.allclose(key_out, ref_k, atol=1e-2, rtol=1e-2)
    assert jnp.allclose(value_out, ref_v, atol=1e-2, rtol=1e-2)

    print("KERNEL_OK")
</pallas_src>

<mosaic_0001>
module attributes {stable_mosaic.version = 11 : i64} {
  func.func @_linear_kernel(%arg0: i32, %arg1: i32, %arg2: i32, %arg3: memref<16x32xbf16, #tpu.memory_space<vmem>>, %arg4: memref<32x96xbf16, #tpu.memory_space<vmem>>, %arg5: memref<1x96xf32, #tpu.memory_space<vmem>>, %arg6: memref<16x96xf32, #tpu.memory_space<vmem>>, %arg7: memref<16x96xf32, #tpu.memory_space<vmem>>) attributes {dimension_semantics = [#tpu.dimension_semantics<parallel>, #tpu.dimension_semantics<parallel>, #tpu.dimension_semantics<arbitrary>], iteration_bounds = array<i64: 1, 1, 1>, scalar_prefetch = 0 : i64, scratch_operands = 1 : i64, tpu.core_type = #tpu.core_type<tc>, window_params = [{transform_indices = @transform_0, window_bounds = array<i64: 16, 32>}, {transform_indices = @transform_1, window_bounds = array<i64: 32, 96>}, {transform_indices = @transform_2, window_bounds = array<i64: 1, 96>}, {transform_indices = @transform_3, window_bounds = array<i64: 16, 96>}]} {
    %c0_i32 = arith.constant 0 : i32
    %0 = arith.cmpi eq, %arg2, %c0_i32 : i32
    %1 = arith.extui %0 : i1 to i32
    %c0_i32_0 = arith.constant 0 : i32
    %2 = arith.cmpi ne, %1, %c0_i32_0 : i32
    scf.if %2 {
      %cst_10 = arith.constant 0.000000e+00 : f32
      %12 = vector.broadcast %cst_10 : f32 to vector<16x96xf32>
      %c0_11 = arith.constant 0 : index
      %c0_12 = arith.constant 0 : index
      %13 = vector.load %arg7[%c0_11, %c0_12] : memref<16x96xf32, #tpu.memory_space<vmem>>, vector<16x96xf32>
      tpu.vector_store %arg7[%c0_11, %c0_12], %12 {strides = array<i32>} : memref<16x96xf32, #tpu.memory_space<vmem>>, vector<16x96xf32>,
    } else {
    }
    %c0 = arith.constant 0 : index
    %c0_1 = arith.constant 0 : index
    %3 = vector.load %arg7[%c0, %c0_1] : memref<16x96xf32, #tpu.memory_space<vmem>>, vector<16x96xf32>
    %c0_2 = arith.constant 0 : index
    %c0_3 = arith.constant 0 : index
    %4 = vector.load %arg3[%c0_2, %c0_3] : memref<16x32xbf16, #tpu.memory_space<vmem>>, vector<16x32xbf16>
    %c0_4 = arith.constant 0 : index
    %c0_5 = arith.constant 0 : index
    %5 = vector.load %arg4[%c0_4, %c0_5] : memref<32x96xbf16, #tpu.memory_space<vmem>>, vector<32x96xbf16>
    %cst = arith.constant dense<0.000000e+00> : vector<16x96xf32>
    %6 = tpu.matmul %4, %5, %cst {dimension_numbers = #tpu.dot_dimension_numbers<[1], [0], [0], [1], [0, 0, 1, 1], [], []>} : vector<16x32xbf16>, vector<32x96xbf16>, vector<16x96xf32> -> vector<16x96xf32>
    %7 = arith.addf %3, %6 : vector<16x96xf32>
    %c0_6 = arith.constant 0 : index
    %c0_7 = arith.constant 0 : index
    %8 = vector.load %arg7[%c0_6, %c0_7] : memref<16x96xf32, #tpu.memory_space<vmem>>, vector<16x96xf32>
    tpu.vector_store %arg7[%c0_6, %c0_7], %7 {strides = array<i32>} : memref<16x96xf32, #tpu.memory_space<vmem>>, vector<16x96xf32>,
    %c0_i32_8 = arith.constant 0 : i32
    %9 = arith.cmpi eq, %arg2, %c0_i32_8 : i32
    %10 = arith.extui %9 : i1 to i32
    %c0_i32_9 = arith.constant 0 : i32
    %11 = arith.cmpi ne, %10, %c0_i32_9 : i32
    scf.if %11 {
      %c0_10 = arith.constant 0 : index
      %c0_11 = arith.constant 0 : index
      %12 = vector.load %arg7[%c0_10, %c0_11] : memref<16x96xf32, #tpu.memory_space<vmem>>, vector<16x96xf32>
      %c0_12 = arith.constant 0 : index
      %c0_13 = arith.constant 0 : index
      %13 = vector.load %arg5[%c0_12, %c0_13] : memref<1x96xf32, #tpu.memory_space<vmem>>, vector<1x96xf32>
      %14 = vector.broadcast %13 : vector<1x96xf32> to vector<16x96xf32>
      %15 = arith.addf %12, %14 : vector<16x96xf32>
      %c0_14 = arith.constant 0 : index
      %c0_15 = arith.constant 0 : index
      %16 = vector.load %arg6[%c0_14, %c0_15] : memref<16x96xf32, #tpu.memory_space<vmem>>, vector<16x96xf32>
      tpu.vector_store %arg6[%c0_14, %c0_15], %15 {strides = array<i32>} : memref<16x96xf32, #tpu.memory_space<vmem>>, vector<16x96xf32>,
    } else {
    }
    return
  }
  func.func @transform_0(%arg0: i32, %arg1: i32, %arg2: i32) -> (i32, i32) {
    %c0_i32 = arith.constant 0 : i32
    return %arg0, %arg2 : i32, i32
  }
  func.func @transform_1(%arg0: i32, %arg1: i32, %arg2: i32) -> (i32, i32) {
    %c0_i32 = arith.constant 0 : i32
    return %arg2, %arg1 : i32, i32
  }
  func.func @transform_2(%arg0: i32, %arg1: i32, %arg2: i32) -> (i32, i32) {
    %c0_i32 = arith.constant 0 : i32
    %c0_i32_0 = arith.constant 0 : i32
    return %c0_i32, %arg1 : i32, i32
  }
  func.func @transform_3(%arg0: i32, %arg1: i32, %arg2: i32) -> (i32, i32) {
    %c0_i32 = arith.constant 0 : i32
    return %arg0, %arg1 : i32, i32
  }
}

</mosaic_0001>

<bundles_post_ra>
// kernel: tpu_custom_call.1
= control target key start
LH: loop header
LB: loop body
LE: loop exit
PB: predicated region body
PF: predicated region fallthrough
CT: control target
= control target key end

     0   :  { %8 = vsyncpa [#allocation4], 0  ;;  %s301_s0 = inlined_call_operand.hbm [shape: bf16[16,32], index: 0, kind: input, shape index: {}]   ;;  %s302_s1 = inlined_call_operand.hbm [shape: bf16[32,96], index: 1, kind: input, shape index: {}]   ;;  %s303_s2 = inlined_call_operand.vmem [shape: f32[1,96], index: 2, kind: input, shape index: {}]   ;;  %s304_s3 = inlined_call_operand.hbm [shape: f32[16,96], index: 3, kind: output, shape index: {}]  }
   0x1   :  { %9 = vsyncpa [#allocation7], 0 }
   0x2   :  { %10 = vsyncpa [#allocation5], 0  ;;  %s254_s12 = smov [#allocation3]  }
   0x3   :  { %s16_s13 = sshll.u32 %s254_s12, 4  ;;  %s17_s13 = int_to_ptr.vmem [resolvable:$true] %s16_s13 }
   0x4   :  { %s196_s14 = scalar_lea.vmem %s17_s13, 128  ;;  %p201_p1 = scmp.lt.s32.totalorder %s17_s13, %s17_s13 }
   0x5   :  { %p197_p0 = scmp.ne.s32.totalorder %s17_s13, %s196_s14  ;;  %p202_p2 = scmp.lt.s32.totalorder %s196_s14, %s196_s14 }
   0x7   :  { %p203_p3 = por %p202_p2, %p201_p1 }
   0x9   :  { %p204_p4 = pnand %p203_p3, %p197_p0 }
   0xb   :  { %207 = shalt.err (!%p204_p4)
}
   0xc   :  { %s255_s15 = smov 64   ;;  %s256_s16 = smov 4  }
   0xd   :  { %22 = dma.hbm_to_vmem [thread:$0]  %s301_s0, 128, %s17_s13, [#allocation4], %s255_s15, %s255_s15, %s256_s16  }
   0xe   :  { %s257_s19 = smov [#allocation6]  }
   0xf   :  { %s28_s20 = sshll.u32 %s257_s19, 4  ;;  %s29_s20 = int_to_ptr.vmem [resolvable:$true] %s28_s20 }
  0x10   :  { %s216_s21 = scalar_lea.vmem %s29_s20, 256  ;;  %p221_p6 = scmp.lt.s32.totalorder %s29_s20, %s29_s20 }
  0x11   :  { %p217_p5 = scmp.ne.s32.totalorder %s29_s20, %s216_s21  ;;  %p222_p7 = scmp.lt.s32.totalorder %s216_s21, %s216_s21 }
  0x13   :  { %p223_p8 = por %p222_p7, %p221_p6 }
  0x15   :  { %p224_p9 = pnand %p223_p8, %p217_p5 }
  0x17   :  { %227 = shalt.err (!%p224_p9)
}
  0x18   :  { %34 = dma.hbm_to_vmem [thread:$0]  %s302_s1, 256, %s29_s20, [#allocation7], %s255_s15, %s255_s15, %s256_s16  }
  0x19   :  { %248 = dma.done.wait [#allocation4], 128  }
  0x1a   :  { %249 = vsyncadd [#allocation4], 4294967168 }
  0x1b   :  { %250 = dma.done.wait [#allocation7], 256  }
  0x1c   :  { %251 = vsyncadd [#allocation7], 4294967040  ;;  %vm48_vm0 = vcmask 785408   ;;  %v258_v0 = vmov 0.0   ;;  %vm259_vm1 = vmmov 0   ;;  %v185_v1 = vld [vmem:[#allocation6 + $0x8] sm:$0xff]  }
  0x1d   :  { %49 = vst.msk [vmem:[#allocation2] sm:$0xff] %vm48_vm0, %v258_v0  ;;  %50 = vst.msk [vmem:[#allocation2 + $0x8] sm:$0xff] %vm48_vm0, %v258_v0  ;;  %168 = vmatprep.subr.bf16.mxu0 %v258_v0  ;;  %172 = vmatprep.mubr.msk.bf16.mxu0 %vm259_vm1, %v258_v0  ;;  %v186_v2 = vld [vmem:[#allocation6] sm:$0xff]   ;;  %v187_v3 = vld [vmem:[#allocation3] sm:$0xff]   ;;  %vm76_vm2 = vcmask 261120   ;;  %s260_s24 = smov [#allocation8]  }
  0x1e   :  { %169 = vmatpush3.bf16.msra.mxu0 %v185_v1  ;;  %v164_v12 = vld [vmem:[%s303_s2] ss:$0 sm:$0xff]  ;;  %s147_s25 = sshll.u32 %s260_s24, 4  ;;  %s148_s25 = int_to_ptr.vmem [resolvable:$true] %s147_s25 }
  0x1f   :  { %170 = vmatprep.subr.bf16.mxu0 %v258_v0  ;;  %s228_s26 = scalar_lea.vmem %s148_s25, 256  ;;  %p233_p11 = scmp.lt.s32.totalorder %s148_s25, %s148_s25 }
  0x20   :  { %p229_p10 = scmp.ne.s32.totalorder %s148_s25, %s228_s26  ;;  %p234_p12 = scmp.lt.s32.totalorder %s228_s26, %s228_s26 }
  0x22   :  { %171 = vmatpush3.bf16.msra.mxu0 %v186_v2  ;;  %p235_p13 = por %p234_p12, %p233_p11 }
  0x24   :  { %v51_v4 = vld [vmem:[#allocation2] sm:$0xff]  ;;  %v52_v8 = vld [vmem:[#allocation2 + $0x8] sm:$0xff]  ;;  %p236_p0 = pnand %p235_p13, %p229_p10 }
  0x25   :  { %173 = vmatmul.mubr.msk.bf16.vlgmr.msra.gmra.mxu0 %vm76_vm2, %v187_v3 }
  0xe5   :  { %v114_v5 = vpop.f32.mrf.mxu0 }
  0xe6   :  { %v121_v6 = vadd.f32 %v114_v5, %v51_v4 }
  0xe7   :  { %v174_v7 = vpop.f32.mrf.mxu0 }
  0xe8   :  { %124 = vst.msk [vmem:[#allocation2] sm:$0xff] %vm48_vm0, %v121_v6 }
  0xe9   :  { %v117_v9 = vpop.f32.mrf.mxu0 }
  0xea   :  { %v122_v10 = vadd.f32 %v117_v9, %v52_v8 }
  0xeb   :  { %v175_v11 = vpop.f32.mrf.mxu0 }
  0xec   :  { %125 = vst.msk [vmem:[#allocation2 + $0x8] sm:$0xff] %vm48_vm0, %v122_v10 }
  0xef   :  { %v129_v13 = vld [vmem:[#allocation2] sm:$0xff] }
  0xf0   :  { %v138_v14 = vadd.f32 %v164_v12, %v129_v13 }
  0xf2   :  { %140 = vst.msk [vmem:[#allocation8] sm:$0xff] %vm48_vm0, %v138_v14 }
  0xf3   :  { %v130_v15 = vld [vmem:[#allocation2 + $0x8] sm:$0xff] }
  0xf4   :  { %v139_v16 = vadd.f32 %v164_v12, %v130_v15 }
  0xf6   :  { %141 = vst.msk [vmem:[#allocation8 + $0x8] sm:$0xff] %vm48_vm0, %v139_v16 }
  0xf7   :  { %239 = shalt.err (!%p236_p0)
}
  0xf8   :  { %s261_s27 = smov 128   ;;  %s262_s2 = smov 8  }
  0xf9   :  { %153 = dma.vmem_to_hbm [thread:$0]  %s148_s25, 256, %s304_s3, [#allocation5], %s261_s27, %s261_s27, %s262_s2  }
  0xfa   :  { %252 = dma.done.wait [#allocation5], 256  }
  0xfb   :  { %253 = vsyncadd [#allocation5], 4294967040 }
  0xfc   :  { %157 = vsyncpa [#allocation4], 1 }
  0xfd   :  { %158 = vsyncpa [#allocation7], 1 }
  0xfe   :  { %159 = vsyncpa [#allocation5], 1 }

</bundles_post_ra>
